<compile_context>
chip_gen: v7x
topology: tpu7x:2x2x1
jax: 0.10.0
libtpu: 0.0.40
codegen_flags: <defaults>
</compile_context>

<pallas_src>
import jax
import jax.numpy as jnp
import numpy as np
from jax.experimental import pallas as pl
from jax.experimental.pallas import tpu as pltpu

# ---- model hyper-parameters (small, consistent with the module) ----
NODE_TYPE = 8
MAX_SEQ_LEN = 8
HIDDEN = 32
LATENT = 16
BATCH = 2
T = MAX_SEQ_LEN - 1              # GRU sequence length
OUT_DIM = NODE_TYPE + MAX_SEQ_LEN


def decoder_kernel(z_ref, wfc_ref, wih_ref, whh_ref, wh1_ref, wh2_ref, bias_ref,
                   out_ref, hbuf_ref):
    f32 = jnp.float32
    H = HIDDEN
    B = z_ref.shape[0]
    n_steps = out_ref.shape[0] // B

    # Hoisted weight / bias loads (one load each; not re-issued per unrolled step).
    wfc = wfc_ref[...]
    wih = wih_ref[...]
    whh = whh_ref[...]
    wh1 = wh1_ref[...]
    wh2 = wh2_ref[...]
    b_fc = bias_ref[0:1, 0:H]
    b_ih = bias_ref[1:2, 0:3 * H]
    b_hh = bias_ref[2:3, 0:3 * H]
    b_h1 = bias_ref[3:4, 0:2 * H]
    b_h2 = bias_ref[4:5, 0:OUT_DIM]

    # h0 = relu(fc_h0(z))
    h0 = jnp.maximum(jnp.dot(z_ref[...], wfc, preferred_element_type=f32) + b_fc, 0.0)

    # GRU input is h0 at every timestep -> input-side gate pre-activations are
    # time-invariant: one fused (B, 3H) matmul, computed once. Gate layout [r|z|n].
    gx = jnp.dot(h0, wih, preferred_element_type=f32) + b_ih
    gx_rz = gx[:, 0:2 * H]
    gx_n = gx[:, 2 * H:3 * H]

    # PyTorch GRU default initial hidden state is zeros.
    h = jnp.zeros_like(h0)
    for t in range(n_steps):
        # One fused hidden-side gate matmul per step (3 -> 1 on the serial path).
        gh = jnp.dot(h, whh, preferred_element_type=f32) + b_hh        # (B, 3H)
        rz = jax.nn.sigmoid(gx_rz + gh[:, 0:2 * H])                    # fused r|z sigmoid
        r = rz[:, 0:H]
        u = rz[:, H:2 * H]
        # b_hn is folded into gh -> stays INSIDE the r-multiplied term (PyTorch GRU).
        n = jnp.tanh(gx_n + r * gh[:, 2 * H:3 * H])
        h = (1.0 - u) * n + u * h
        hbuf_ref[t * B:(t + 1) * B, :] = h

    # Heads hoisted out of the recurrence: run once over all T*B hidden states.
    h_all = hbuf_ref[...]                                              # (T*B, H)
    hid = jnp.maximum(jnp.dot(h_all, wh1, preferred_element_type=f32) + b_h1, 0.0)
    logits = jnp.dot(hid, wh2, preferred_element_type=f32) + b_h2      # (T*B, 16)

    # Sigmoid only on the edge lanes; single lane-dense output store.
    lane = jax.lax.broadcasted_iota(jnp.int32, logits.shape, 1)
    out_ref[...] = jnp.where(lane < NODE_TYPE, logits, jax.nn.sigmoid(logits))


def init_params(key):
    """Deterministic synthetic parameters. Weights are (in, out); biases (1, out)."""
    def w(k, shape, scale=0.1):
        return scale * jax.random.normal(k, shape, dtype=jnp.float32)

    keys = jax.random.split(key, 24)
    p = {}
    p["wfc"] = w(keys[0], (LATENT, HIDDEN))
    p["bfc"] = w(keys[1], (1, HIDDEN))
    # GRU input weights (r, z, n gates)
    p["wir"] = w(keys[2], (HIDDEN, HIDDEN))
    p["wiz"] = w(keys[3], (HIDDEN, HIDDEN))
    p["win"] = w(keys[4], (HIDDEN, HIDDEN))
    # GRU hidden weights
    p["whr"] = w(keys[5], (HIDDEN, HIDDEN))
    p["whz"] = w(keys[6], (HIDDEN, HIDDEN))
    p["whn"] = w(keys[7], (HIDDEN, HIDDEN))
    # GRU biases
    p["bir"] = w(keys[8], (1, HIDDEN))
    p["biz"] = w(keys[9], (1, HIDDEN))
    p["bin"] = w(keys[10], (1, HIDDEN))
    p["bhr"] = w(keys[11], (1, HIDDEN))
    p["bhz"] = w(keys[12], (1, HIDDEN))
    p["bhn"] = w(keys[13], (1, HIDDEN))
    # add_vertex head
    p["wv1"] = w(keys[14], (HIDDEN, HIDDEN))
    p["bv1"] = w(keys[15], (1, HIDDEN))
    p["wv2"] = w(keys[16], (HIDDEN, NODE_TYPE))
    p["bv2"] = w(keys[17], (1, NODE_TYPE))
    # add_edges head
    p["we1"] = w(keys[18], (HIDDEN, HIDDEN))
    p["be1"] = w(keys[19], (1, HIDDEN))
    p["we2"] = w(keys[20], (HIDDEN, MAX_SEQ_LEN))
    p["be2"] = w(keys[21], (1, MAX_SEQ_LEN))
    return p


def pack_params(p):
    """Host-side fusion of the 22 parameter tensors into 6 slabs."""
    wih = jnp.concatenate([p["wir"], p["wiz"], p["win"]], axis=1)        # (H, 3H)
    whh = jnp.concatenate([p["whr"], p["whz"], p["whn"]], axis=1)        # (H, 3H)
    wh1 = jnp.concatenate([p["wv1"], p["we1"]], axis=1)                  # (H, 2H)
    # Block-diagonal second head layer: [wv2 0; 0 we2]  -> (2H, OUT_DIM)
    wh2 = jnp.zeros((2 * HIDDEN, OUT_DIM), jnp.float32)
    wh2 = wh2.at[:HIDDEN, :NODE_TYPE].set(p["wv2"])
    wh2 = wh2.at[HIDDEN:, NODE_TYPE:].set(p["we2"])
    # All biases packed into one (5, 3H) slab (zero padded).
    bias = jnp.zeros((5, 3 * HIDDEN), jnp.float32)
    bias = bias.at[0, :HIDDEN].set(p["bfc"][0])
    bias = bias.at[1, :].set(jnp.concatenate([p["bir"], p["biz"], p["bin"]], axis=1)[0])
    bias = bias.at[2, :].set(jnp.concatenate([p["bhr"], p["bhz"], p["bhn"]], axis=1)[0])
    bias = bias.at[3, :2 * HIDDEN].set(jnp.concatenate([p["bv1"], p["be1"]], axis=1)[0])
    bias = bias.at[4, :OUT_DIM].set(jnp.concatenate([p["bv2"], p["be2"]], axis=1)[0])
    return p["wfc"], wih, whh, wh1, wh2, bias


def decoder_forward(z, packed):
    wfc, wih, whh, wh1, wh2, bias = packed
    B = z.shape[0]
    vmem = pl.BlockSpec(memory_space=pltpu.MemorySpace.VMEM)
    fused = pl.pallas_call(
        decoder_kernel,
        out_shape=jax.ShapeDtypeStruct((T * B, OUT_DIM), jnp.float32),
        in_specs=[vmem] * 7,
        out_specs=vmem,
        scratch_shapes=[pltpu.VMEM((T * B, HIDDEN), jnp.float32)],
    )(z, wfc, wih, whh, wh1, wh2, bias)
    # Kernel rows are (t-major, b-minor); recover PyTorch (B, T, ·) layout and split.
    fused = fused.reshape(T, B, OUT_DIM).transpose(1, 0, 2)
    return fused[:, :, :NODE_TYPE], fused[:, :, NODE_TYPE:]


def decoder_reference(z, p):
    """Pure-JAX reference matching PyTorch semantics (unfused parameters)."""
    h0 = jax.nn.relu(z @ p["wfc"] + p["bfc"])
    gx_r = h0 @ p["wir"] + p["bir"]
    gx_z = h0 @ p["wiz"] + p["biz"]
    gx_n = h0 @ p["win"] + p["bin"]
    h = jnp.zeros_like(h0)
    types, edges = [], []
    for _ in range(T):
        gh_r = h @ p["whr"] + p["bhr"]
        gh_z = h @ p["whz"] + p["bhz"]
        gh_n = h @ p["whn"] + p["bhn"]
        r = jax.nn.sigmoid(gx_r + gh_r)
        u = jax.nn.sigmoid(gx_z + gh_z)
        n = jnp.tanh(gx_n + r * gh_n)
        h = (1.0 - u) * n + u * h
        v = jax.nn.relu(h @ p["wv1"] + p["bv1"])
        types.append(v @ p["wv2"] + p["bv2"])
        e = jax.nn.relu(h @ p["we1"] + p["be1"])
        edges.append(jax.nn.sigmoid(e @ p["we2"] + p["be2"]))
    return jnp.stack(types, axis=1), jnp.stack(edges, axis=1)


if __name__ == "__main__":
    key = jax.random.PRNGKey(0)
    k_param, k_z = jax.random.split(key)
    params = init_params(k_param)
    packed = pack_params(params)
    z = jax.random.normal(k_z, (BATCH, LATENT), dtype=jnp.float32)

    type_scores, edge_scores = decoder_forward(z, packed)
    jax.block_until_ready((type_scores, edge_scores))

    ref_type, ref_edge = decoder_reference(z, params)
    np.testing.assert_allclose(np.asarray(type_scores), np.asarray(ref_type),
                               rtol=1e-2, atol=1e-2)
    np.testing.assert_allclose(np.asarray(edge_scores), np.asarray(ref_edge),
                               rtol=1e-2, atol=1e-2)

    assert type_scores.shape == (BATCH, T, NODE_TYPE)
    assert edge_scores.shape == (BATCH, T, MAX_SEQ_LEN)
    print("KERNEL_OK")
</pallas_src>

<mosaic_0001>
module attributes {stable_mosaic.version = 11 : i64} {
  func.func @decoder_kernel(%arg0: memref<2x16xf32, #tpu.memory_space<vmem>>, %arg1: memref<16x32xf32, #tpu.memory_space<vmem>>, %arg2: memref<32x96xf32, #tpu.memory_space<vmem>>, %arg3: memref<32x96xf32, #tpu.memory_space<vmem>>, %arg4: memref<32x64xf32, #tpu.memory_space<vmem>>, %arg5: memref<64x16xf32, #tpu.memory_space<vmem>>, %arg6: memref<5x96xf32, #tpu.memory_space<vmem>>, %arg7: memref<14x16xf32, #tpu.memory_space<vmem>>, %arg8: memref<14x32xf32, #tpu.memory_space<vmem>>) attributes {dimension_semantics = [], scalar_prefetch = 0 : i64, scratch_operands = 1 : i64, tpu.core_type = #tpu.core_type<tc>} {
    %c0 = arith.constant 0 : index
    %c0_0 = arith.constant 0 : index
    %0 = vector.load %arg1[%c0, %c0_0] : memref<16x32xf32, #tpu.memory_space<vmem>>, vector<16x32xf32>
    %c0_1 = arith.constant 0 : index
    %c0_2 = arith.constant 0 : index
    %1 = vector.load %arg2[%c0_1, %c0_2] : memref<32x96xf32, #tpu.memory_space<vmem>>, vector<32x96xf32>
    %c0_3 = arith.constant 0 : index
    %c0_4 = arith.constant 0 : index
    %2 = vector.load %arg3[%c0_3, %c0_4] : memref<32x96xf32, #tpu.memory_space<vmem>>, vector<32x96xf32>
    %c0_5 = arith.constant 0 : index
    %c0_6 = arith.constant 0 : index
    %3 = vector.load %arg4[%c0_5, %c0_6] : memref<32x64xf32, #tpu.memory_space<vmem>>, vector<32x64xf32>
    %c0_7 = arith.constant 0 : index
    %c0_8 = arith.constant 0 : index
    %4 = vector.load %arg5[%c0_7, %c0_8] : memref<64x16xf32, #tpu.memory_space<vmem>>, vector<64x16xf32>
    %c0_9 = arith.constant 0 : index
    %c0_10 = arith.constant 0 : index
    %5 = vector.load %arg6[%c0_9, %c0_10] : memref<5x96xf32, #tpu.memory_space<vmem>>, vector<1x32xf32>
    %c1 = arith.constant 1 : index
    %c0_11 = arith.constant 0 : index
    %6 = vector.load %arg6[%c1, %c0_11] : memref<5x96xf32, #tpu.memory_space<vmem>>, vector<1x96xf32>
    %c2 = arith.constant 2 : index
    %c0_12 = arith.constant 0 : index
    %7 = vector.load %arg6[%c2, %c0_12] : memref<5x96xf32, #tpu.memory_space<vmem>>, vector<1x96xf32>
    %c3 = arith.constant 3 : index
    %c0_13 = arith.constant 0 : index
    %8 = vector.load %arg6[%c3, %c0_13] : memref<5x96xf32, #tpu.memory_space<vmem>>, vector<1x64xf32>
    %c4 = arith.constant 4 : index
    %c0_14 = arith.constant 0 : index
    %9 = vector.load %arg6[%c4, %c0_14] : memref<5x96xf32, #tpu.memory_space<vmem>>, vector<1x16xf32>
    %c0_15 = arith.constant 0 : index
    %c0_16 = arith.constant 0 : index
    %10 = vector.load %arg0[%c0_15, %c0_16] : memref<2x16xf32, #tpu.memory_space<vmem>>, vector<2x16xf32>
    %cst = arith.constant dense<0.000000e+00> : vector<2x32xf32>
    %11 = tpu.matmul %10, %0, %cst {dimension_numbers = #tpu.dot_dimension_numbers<[1], [0], [0], [1], [0, 0, 1, 1], [], []>} : vector<2x16xf32>, vector<16x32xf32>, vector<2x32xf32> -> vector<2x32xf32>
    %12 = vector.broadcast %5 : vector<1x32xf32> to vector<2x32xf32>
    %13 = arith.addf %11, %12 : vector<2x32xf32>
    %cst_17 = arith.constant 0.000000e+00 : f32
    %14 = vector.broadcast %cst_17 : f32 to vector<2x32xf32>
    %15 = arith.maximumf %13, %14 : vector<2x32xf32>
    %cst_18 = arith.constant dense<0.000000e+00> : vector<2x96xf32>
    %16 = tpu.matmul %15, %1, %cst_18 {dimension_numbers = #tpu.dot_dimension_numbers<[1], [0], [0], [1], [0, 0, 1, 1], [], []>} : vector<2x32xf32>, vector<32x96xf32>, vector<2x96xf32> -> vector<2x96xf32>
    %17 = vector.broadcast %6 : vector<1x96xf32> to vector<2x96xf32>
    %18 = arith.addf %16, %17 : vector<2x96xf32>
    %19 = vector.extract_strided_slice %18 {offsets = [0, 0], sizes = [2, 64], strides = [1, 1]} : vector<2x96xf32> to vector<2x64xf32>
    %20 = vector.extract_strided_slice %18 {offsets = [0, 64], sizes = [2, 32], strides = [1, 1]} : vector<2x96xf32> to vector<2x32xf32>
    %cst_19 = arith.constant 0.000000e+00 : f32
    %21 = vector.broadcast %cst_19 : f32 to vector<2x32xf32>
    %cst_20 = arith.constant dense<0.000000e+00> : vector<2x96xf32>
    %22 = tpu.matmul %21, %2, %cst_20 {dimension_numbers = #tpu.dot_dimension_numbers<[1], [0], [0], [1], [0, 0, 1, 1], [], []>} : vector<2x32xf32>, vector<32x96xf32>, vector<2x96xf32> -> vector<2x96xf32>
    %23 = vector.broadcast %7 : vector<1x96xf32> to vector<2x96xf32>
    %24 = arith.addf %22, %23 : vector<2x96xf32>
    %25 = vector.extract_strided_slice %24 {offsets = [0, 0], sizes = [2, 64], strides = [1, 1]} : vector<2x96xf32> to vector<2x64xf32>
    %26 = arith.addf %19, %25 : vector<2x64xf32>
    %27 = arith.negf %26 : vector<2x64xf32>
    %28 = math.exp %27 : vector<2x64xf32>
    %cst_21 = arith.constant 1.000000e+00 : f32
    %29 = vector.broadcast %cst_21 : f32 to vector<2x64xf32>
    %30 = arith.addf %29, %28 : vector<2x64xf32>
    %31 = arith.divf %29, %30 : vector<2x64xf32>
    %32 = vector.extract_strided_slice %31 {offsets = [0, 0], sizes = [2, 32], strides = [1, 1]} : vector<2x64xf32> to vector<2x32xf32>
    %33 = vector.extract_strided_slice %31 {offsets = [0, 32], sizes = [2, 32], strides = [1, 1]} : vector<2x64xf32> to vector<2x32xf32>
    %34 = vector.extract_strided_slice %24 {offsets = [0, 64], sizes = [2, 32], strides = [1, 1]} : vector<2x96xf32> to vector<2x32xf32>
    %35 = arith.mulf %32, %34 : vector<2x32xf32>
    %36 = arith.addf %20, %35 : vector<2x32xf32>
    %37 = math.tanh %36 : vector<2x32xf32>
    %cst_22 = arith.constant 1.000000e+00 : f32
    %38 = vector.broadcast %cst_22 : f32 to vector<2x32xf32>
    %39 = arith.subf %38, %33 : vector<2x32xf32>
    %40 = arith.mulf %39, %37 : vector<2x32xf32>
    %41 = arith.mulf %33, %21 : vector<2x32xf32>
    %42 = arith.addf %40, %41 : vector<2x32xf32>
    %c0_23 = arith.constant 0 : index
    %c0_24 = arith.constant 0 : index
    %43 = vector.load %arg8[%c0_23, %c0_24] : memref<14x32xf32, #tpu.memory_space<vmem>>, vector<2x32xf32>
    tpu.vector_store %arg8[%c0_23, %c0_24], %42 {strides = array<i32>} : memref<14x32xf32, #tpu.memory_space<vmem>>, vector<2x32xf32>,
    %cst_25 = arith.constant dense<0.000000e+00> : vector<2x96xf32>
    %44 = tpu.matmul %42, %2, %cst_25 {dimension_numbers = #tpu.dot_dimension_numbers<[1], [0], [0], [1], [0, 0, 1, 1], [], []>} : vector<2x32xf32>, vector<32x96xf32>, vector<2x96xf32> -> vector<2x96xf32>
    %45 = vector.broadcast %7 : vector<1x96xf32> to vector<2x96xf32>
    %46 = arith.addf %44, %45 : vector<2x96xf32>
    %47 = vector.extract_strided_slice %46 {offsets = [0, 0], sizes = [2, 64], strides = [1, 1]} : vector<2x96xf32> to vector<2x64xf32>
    %48 = arith.addf %19, %47 : vector<2x64xf32>
    %49 = arith.negf %48 : vector<2x64xf32>
    %50 = math.exp %49 : vector<2x64xf32>
    %cst_26 = arith.constant 1.000000e+00 : f32
    %51 = vector.broadcast %cst_26 : f32 to vector<2x64xf32>
    %52 = arith.addf %51, %50 : vector<2x64xf32>
    %53 = arith.divf %51, %52 : vector<2x64xf32>
    %54 = vector.extract_strided_slice %53 {offsets = [0, 0], sizes = [2, 32], strides = [1, 1]} : vector<2x64xf32> to vector<2x32xf32>
    %55 = vector.extract_strided_slice %53 {offsets = [0, 32], sizes = [2, 32], strides = [1, 1]} : vector<2x64xf32> to vector<2x32xf32>
    %56 = vector.extract_strided_slice %46 {offsets = [0, 64], sizes = [2, 32], strides = [1, 1]} : vector<2x96xf32> to vector<2x32xf32>
    %57 = arith.mulf %54, %56 : vector<2x32xf32>
    %58 = arith.addf %20, %57 : vector<2x32xf32>
    %59 = math.tanh %58 : vector<2x32xf32>
    %cst_27 = arith.constant 1.000000e+00 : f32
    %60 = vector.broadcast %cst_27 : f32 to vector<2x32xf32>
    %61 = arith.subf %60, %55 : vector<2x32xf32>
    %62 = arith.mulf %61, %59 : vector<2x32xf32>
    %63 = arith.mulf %55, %42 : vector<2x32xf32>
    %64 = arith.addf %62, %63 : vector<2x32xf32>
    %c2_28 = arith.constant 2 : index
    %c0_29 = arith.constant 0 : index
    %65 = vector.load %arg8[%c2_28, %c0_29] : memref<14x32xf32, #tpu.memory_space<vmem>>, vector<2x32xf32>
    tpu.vector_store %arg8[%c2_28, %c0_29], %64 {strides = array<i32>} : memref<14x32xf32, #tpu.memory_space<vmem>>, vector<2x32xf32>,
    %cst_30 = arith.constant dense<0.000000e+00> : vector<2x96xf32>
    %66 = tpu.matmul %64, %2, %cst_30 {dimension_numbers = #tpu.dot_dimension_numbers<[1], [0], [0], [1], [0, 0, 1, 1], [], []>} : vector<2x32xf32>, vector<32x96xf32>, vector<2x96xf32> -> vector<2x96xf32>
    %67 = vector.broadcast %7 : vector<1x96xf32> to vector<2x96xf32>
    %68 = arith.addf %66, %67 : vector<2x96xf32>
    %69 = vector.extract_strided_slice %68 {offsets = [0, 0], sizes = [2, 64], strides = [1, 1]} : vector<2x96xf32> to vector<2x64xf32>
    %70 = arith.addf %19, %69 : vector<2x64xf32>
    %71 = arith.negf %70 : vector<2x64xf32>
    %72 = math.exp %71 : vector<2x64xf32>
    %cst_31 = arith.constant 1.000000e+00 : f32
    %73 = vector.broadcast %cst_31 : f32 to vector<2x64xf32>
    %74 = arith.addf %73, %72 : vector<2x64xf32>
    %75 = arith.divf %73, %74 : vector<2x64xf32>
    %76 = vector.extract_strided_slice %75 {offsets = [0, 0], sizes = [2, 32], strides = [1, 1]} : vector<2x64xf32> to vector<2x32xf32>
    %77 = vector.extract_strided_slice %75 {offsets = [0, 32], sizes = [2, 32], strides = [1, 1]} : vector<2x64xf32> to vector<2x32xf32>
    %78 = vector.extract_strided_slice %68 {offsets = [0, 64], sizes = [2, 32], strides = [1, 1]} : vector<2x96xf32> to vector<2x32xf32>
    %79 = arith.mulf %76, %78 : vector<2x32xf32>
    %80 = arith.addf %20, %79 : vector<2x32xf32>
    %81 = math.tanh %80 : vector<2x32xf32>
    %cst_32 = arith.constant 1.000000e+00 : f32
    %82 = vector.broadcast %cst_32 : f32 to vector<2x32xf32>
    %83 = arith.subf %82, %77 : vector<2x32xf32>
    %84 = arith.mulf %83, %81 : vector<2x32xf32>
    %85 = arith.mulf %77, %64 : vector<2x32xf32>
    %86 = arith.addf %84, %85 : vector<2x32xf32>
    %c4_33 = arith.constant 4 : index
    %c0_34 = arith.constant 0 : index
    %87 = vector.load %arg8[%c4_33, %c0_34] : memref<14x32xf32, #tpu.memory_space<vmem>>, vector<2x32xf32>
    tpu.vector_store %arg8[%c4_33, %c0_34], %86 {strides = array<i32>} : memref<14x32xf32, #tpu.memory_space<vmem>>, vector<2x32xf32>,
    %cst_35 = arith.constant dense<0.000000e+00> : vector<2x96xf32>
    %88 = tpu.matmul %86, %2, %cst_35 {dimension_numbers = #tpu.dot_dimension_numbers<[1], [0], [0], [1], [0, 0, 1, 1], [], []>} : vector<2x32xf32>, vector<32x96xf32>, vector<2x96xf32> -> vector<2x96xf32>
    %89 = vector.broadcast %7 : vector<1x96xf32> to vector<2x96xf32>
    %90 = arith.addf %88, %89 : vector<2x96xf32>
    %91 = vector.extract_strided_slice %90 {offsets = [0, 0], sizes = [2, 64], strides = [1, 1]} : vector<2x96xf32> to vector<2x64xf32>
    %92 = arith.addf %19, %91 : vector<2x64xf32>
    %93 = arith.negf %92 : vector<2x64xf32>
    %94 = math.exp %93 : vector<2x64xf32>
    %cst_36 = arith.constant 1.000000e+00 : f32
    %95 = vector.broadcast %cst_36 : f32 to vector<2x64xf32>
    %96 = arith.addf %95, %94 : vector<2x64xf32>
    %97 = arith.divf %95, %96 : vector<2x64xf32>
    %98 = vector.extract_strided_slice %97 {offsets = [0, 0], sizes = [2, 32], strides = [1, 1]} : vector<2x64xf32> to vector<2x32xf32>
    %99 = vector.extract_strided_slice %97 {offsets = [0, 32], sizes = [2, 32], strides = [1, 1]} : vector<2x64xf32> to vector<2x32xf32>
    %100 = vector.extract_strided_slice %90 {offsets = [0, 64], sizes = [2, 32], strides = [1, 1]} : vector<2x96xf32> to vector<2x32xf32>
    %101 = arith.mulf %98, %100 : vector<2x32xf32>
    %102 = arith.addf %20, %101 : vector<2x32xf32>
    %103 = math.tanh %102 : vector<2x32xf32>
    %cst_37 = arith.constant 1.000000e+00 : f32
    %104 = vector.broadcast %cst_37 : f32 to vector<2x32xf32>
    %105 = arith.subf %104, %99 : vector<2x32xf32>
    %106 = arith.mulf %105, %103 : vector<2x32xf32>
    %107 = arith.mulf %99, %86 : vector<2x32xf32>
    %108 = arith.addf %106, %107 : vector<2x32xf32>
    %c6 = arith.constant 6 : index
    %c0_38 = arith.constant 0 : index
    %109 = vector.load %arg8[%c6, %c0_38] : memref<14x32xf32, #tpu.memory_space<vmem>>, vector<2x32xf32>
    tpu.vector_store %arg8[%c6, %c0_38], %108 {strides = array<i32>} : memref<14x32xf32, #tpu.memory_space<vmem>>, vector<2x32xf32>,
    %cst_39 = arith.constant dense<0.000000e+00> : vector<2x96xf32>
    %110 = tpu.matmul %108, %2, %cst_39 {dimension_numbers = #tpu.dot_dimension_numbers<[1], [0], [0], [1], [0, 0, 1, 1], [], []>} : vector<2x32xf32>, vector<32x96xf32>, vector<2x96xf32> -> vector<2x96xf32>
    %111 = vector.broadcast %7 : vector<1x96xf32> to vector<2x96xf32>
    %112 = arith.addf %110, %111 : vector<2x96xf32>
    %113 = vector.extract_strided_slice %112 {offsets = [0, 0], sizes = [2, 64], strides = [1, 1]} : vector<2x96xf32> to vector<2x64xf32>
    %114 = arith.addf %19, %113 : vector<2x64xf32>
    %115 = arith.negf %114 : vector<2x64xf32>
    %116 = math.exp %115 : vector<2x64xf32>
    %cst_40 = arith.constant 1.000000e+00 : f32
    %117 = vector.broadcast %cst_40 : f32 to vector<2x64xf32>
    %118 = arith.addf %117, %116 : vector<2x64xf32>
    %119 = arith.divf %117, %118 : vector<2x64xf32>
    %120 = vector.extract_strided_slice %119 {offsets = [0, 0], sizes = [2, 32], strides = [1, 1]} : vector<2x64xf32> to vector<2x32xf32>
    %121 = vector.extract_strided_slice %119 {offsets = [0, 32], sizes = [2, 32], strides = [1, 1]} : vector<2x64xf32> to vector<2x32xf32>
    %122 = vector.extract_strided_slice %112 {offsets = [0, 64], sizes = [2, 32], strides = [1, 1]} : vector<2x96xf32> to vector<2x32xf32>
    %123 = arith.mulf %120, %122 : vector<2x32xf32>
    %124 = arith.addf %20, %123 : vector<2x32xf32>
    %125 = math.tanh %124 : vector<2x32xf32>
    %cst_41 = arith.constant 1.000000e+00 : f32
    %126 = vector.broadcast %cst_41 : f32 to vector<2x32xf32>
    %127 = arith.subf %126, %121 : vector<2x32xf32>
    %128 = arith.mulf %127, %125 : vector<2x32xf32>
    %129 = arith.mulf %121, %108 : vector<2x32xf32>
    %130 = arith.addf %128, %129 : vector<2x32xf32>
    %c8 = arith.constant 8 : index
    %c0_42 = arith.constant 0 : index
    %131 = vector.load %arg8[%c8, %c0_42] : memref<14x32xf32, #tpu.memory_space<vmem>>, vector<2x32xf32>
    tpu.vector_store %arg8[%c8, %c0_42], %130 {strides = array<i32>} : memref<14x32xf32, #tpu.memory_space<vmem>>, vector<2x32xf32>,
    %cst_43 = arith.constant dense<0.000000e+00> : vector<2x96xf32>
    %132 = tpu.matmul %130, %2, %cst_43 {dimension_numbers = #tpu.dot_dimension_numbers<[1], [0], [0], [1], [0, 0, 1, 1], [], []>} : vector<2x32xf32>, vector<32x96xf32>, vector<2x96xf32> -> vector<2x96xf32>
    %133 = vector.broadcast %7 : vector<1x96xf32> to vector<2x96xf32>
    %134 = arith.addf %132, %133 : vector<2x96xf32>
    %135 = vector.extract_strided_slice %134 {offsets = [0, 0], sizes = [2, 64], strides = [1, 1]} : vector<2x96xf32> to vector<2x64xf32>
    %136 = arith.addf %19, %135 : vector<2x64xf32>
    %137 = arith.negf %136 : vector<2x64xf32>
    %138 = math.exp %137 : vector<2x64xf32>
    %cst_44 = arith.constant 1.000000e+00 : f32
    %139 = vector.broadcast %cst_44 : f32 to vector<2x64xf32>
    %140 = arith.addf %139, %138 : vector<2x64xf32>
    %141 = arith.divf %139, %140 : vector<2x64xf32>
    %142 = vector.extract_strided_slice %141 {offsets = [0, 0], sizes = [2, 32], strides = [1, 1]} : vector<2x64xf32> to vector<2x32xf32>
    %143 = vector.extract_strided_slice %141 {offsets = [0, 32], sizes = [2, 32], strides = [1, 1]} : vector<2x64xf32> to vector<2x32xf32>
    %144 = vector.extract_strided_slice %134 {offsets = [0, 64], sizes = [2, 32], strides = [1, 1]} : vector<2x96xf32> to vector<2x32xf32>
    %145 = arith.mulf %142, %144 : vector<2x32xf32>
    %146 = arith.addf %20, %145 : vector<2x32xf32>
    %147 = math.tanh %146 : vector<2x32xf32>
    %cst_45 = arith.constant 1.000000e+00 : f32
    %148 = vector.broadcast %cst_45 : f32 to vector<2x32xf32>
    %149 = arith.subf %148, %143 : vector<2x32xf32>
    %150 = arith.mulf %149, %147 : vector<2x32xf32>
    %151 = arith.mulf %143, %130 : vector<2x32xf32>
    %152 = arith.addf %150, %151 : vector<2x32xf32>
    %c10 = arith.constant 10 : index
    %c0_46 = arith.constant 0 : index
    %153 = vector.load %arg8[%c10, %c0_46] : memref<14x32xf32, #tpu.memory_space<vmem>>, vector<2x32xf32>
    tpu.vector_store %arg8[%c10, %c0_46], %152 {strides = array<i32>} : memref<14x32xf32, #tpu.memory_space<vmem>>, vector<2x32xf32>,
    %cst_47 = arith.constant dense<0.000000e+00> : vector<2x96xf32>
    %154 = tpu.matmul %152, %2, %cst_47 {dimension_numbers = #tpu.dot_dimension_numbers<[1], [0], [0], [1], [0, 0, 1, 1], [], []>} : vector<2x32xf32>, vector<32x96xf32>, vector<2x96xf32> -> vector<2x96xf32>
    %155 = vector.broadcast %7 : vector<1x96xf32> to vector<2x96xf32>
    %156 = arith.addf %154, %155 : vector<2x96xf32>
    %157 = vector.extract_strided_slice %156 {offsets = [0, 0], sizes = [2, 64], strides = [1, 1]} : vector<2x96xf32> to vector<2x64xf32>
    %158 = arith.addf %19, %157 : vector<2x64xf32>
    %159 = arith.negf %158 : vector<2x64xf32>
    %160 = math.exp %159 : vector<2x64xf32>
    %cst_48 = arith.constant 1.000000e+00 : f32
    %161 = vector.broadcast %cst_48 : f32 to vector<2x64xf32>
    %162 = arith.addf %161, %160 : vector<2x64xf32>
    %163 = arith.divf %161, %162 : vector<2x64xf32>
    %164 = vector.extract_strided_slice %163 {offsets = [0, 0], sizes = [2, 32], strides = [1, 1]} : vector<2x64xf32> to vector<2x32xf32>
    %165 = vector.extract_strided_slice %163 {offsets = [0, 32], sizes = [2, 32], strides = [1, 1]} : vector<2x64xf32> to vector<2x32xf32>
    %166 = vector.extract_strided_slice %156 {offsets = [0, 64], sizes = [2, 32], strides = [1, 1]} : vector<2x96xf32> to vector<2x32xf32>
    %167 = arith.mulf %164, %166 : vector<2x32xf32>
    %168 = arith.addf %20, %167 : vector<2x32xf32>
    %169 = math.tanh %168 : vector<2x32xf32>
    %cst_49 = arith.constant 1.000000e+00 : f32
    %170 = vector.broadcast %cst_49 : f32 to vector<2x32xf32>
    %171 = arith.subf %170, %165 : vector<2x32xf32>
    %172 = arith.mulf %171, %169 : vector<2x32xf32>
    %173 = arith.mulf %165, %152 : vector<2x32xf32>
    %174 = arith.addf %172, %173 : vector<2x32xf32>
    %c12 = arith.constant 12 : index
    %c0_50 = arith.constant 0 : index
    %175 = vector.load %arg8[%c12, %c0_50] : memref<14x32xf32, #tpu.memory_space<vmem>>, vector<2x32xf32>
    tpu.vector_store %arg8[%c12, %c0_50], %174 {strides = array<i32>} : memref<14x32xf32, #tpu.memory_space<vmem>>, vector<2x32xf32>,
    %c0_51 = arith.constant 0 : index
    %c0_52 = arith.constant 0 : index
    %176 = vector.load %arg8[%c0_51, %c0_52] : memref<14x32xf32, #tpu.memory_space<vmem>>, vector<14x32xf32>
    %cst_53 = arith.constant dense<0.000000e+00> : vector<14x64xf32>
    %177 = tpu.matmul %176, %3, %cst_53 {dimension_numbers = #tpu.dot_dimension_numbers<[1], [0], [0], [1], [0, 0, 1, 1], [], []>} : vector<14x32xf32>, vector<32x64xf32>, vector<14x64xf32> -> vector<14x64xf32>
    %178 = vector.broadcast %8 : vector<1x64xf32> to vector<14x64xf32>
    %179 = arith.addf %177, %178 : vector<14x64xf32>
    %cst_54 = arith.constant 0.000000e+00 : f32
    %180 = vector.broadcast %cst_54 : f32 to vector<14x64xf32>
    %181 = arith.maximumf %179, %180 : vector<14x64xf32>
    %cst_55 = arith.constant dense<0.000000e+00> : vector<14x16xf32>
    %182 = tpu.matmul %181, %4, %cst_55 {dimension_numbers = #tpu.dot_dimension_numbers<[1], [0], [0], [1], [0, 0, 1, 1], [], []>} : vector<14x64xf32>, vector<64x16xf32>, vector<14x16xf32> -> vector<14x16xf32>
    %183 = vector.broadcast %9 : vector<1x16xf32> to vector<14x16xf32>
    %184 = arith.addf %182, %183 : vector<14x16xf32>
    %185 = tpu.iota {dimensions = array<i32: 1>} : vector<14x16xi32>
    %c8_i32 = arith.constant 8 : i32
    %186 = vector.broadcast %c8_i32 : i32 to vector<14x16xi32>
    %187 = arith.cmpi slt, %185, %186 : vector<14x16xi32>
    %188 = arith.negf %184 : vector<14x16xf32>
    %189 = math.exp %188 : vector<14x16xf32>
    %cst_56 = arith.constant 1.000000e+00 : f32
    %190 = vector.broadcast %cst_56 : f32 to vector<14x16xf32>
    %191 = arith.addf %190, %189 : vector<14x16xf32>
    %192 = arith.divf %190, %191 : vector<14x16xf32>
    %193 = arith.select %187, %184, %192 : vector<14x16xi1>, vector<14x16xf32>
    %c0_57 = arith.constant 0 : index
    %c0_58 = arith.constant 0 : index
    %194 = vector.load %arg7[%c0_57, %c0_58] : memref<14x16xf32, #tpu.memory_space<vmem>>, vector<14x16xf32>
    tpu.vector_store %arg7[%c0_57, %c0_58], %193 {strides = array<i32>} : memref<14x16xf32, #tpu.memory_space<vmem>>, vector<14x16xf32>,
    return
  }
}

</mosaic_0001>

<bundles_post_ra>
// kernel: tpu_custom_call.1
= control target key start
LH: loop header
LB: loop body
LE: loop exit
PB: predicated region body
PF: predicated region fallthrough
CT: control target
= control target key end

     0   :  { %12 = vsyncpa [#allocation4], 0  ;;  %s1913_s0 = inlined_call_operand.hbm [shape: f32[2,16], index: 0, kind: input, shape index: {}]   ;;  %s1914_s1 = inlined_call_operand.vmem [shape: f32[16,32], index: 1, kind: input, shape index: {}]   ;;  %s1915_s2 = inlined_call_operand.vmem [shape: f32[32,96], index: 2, kind: input, shape index: {}]   ;;  %s1916_s3 = inlined_call_operand.vmem [shape: f32[32,96], index: 3, kind: input, shape index: {}]   ;;  %s1917_s4 = inlined_call_operand.hbm [shape: f32[32,64], index: 4, kind: input, shape index: {}]   ;;  %s1918_s5 = inlined_call_operand.vmem [shape: f32[64,16], index: 5, kind: input, shape index: {}]   ;;  %s1919_s6 = inlined_call_operand.hbm [shape: f32[5,96], index: 6, kind: input, shape index: {}]   ;;  %s1920_s7 = inlined_call_operand.hbm [shape: f32[14,16], index: 7, kind: output, shape index: {}]  }
   0x1   :  { %13 = vsyncpa [#allocation7], 0 }
   0x2   :  { %14 = vsyncpa [#allocation5], 0  ;;  %s1629_s24 = smov [#allocation6]   ;;  %s1535_s28 = scalar_lea.hbm %s1917_s4, 512 }
   0x3   :  { %s36_s25 = sshll.u32 %s1629_s24, 4  ;;  %p1536_p0 = scmp.ne.s32.totalorder %s1917_s4, %s1535_s28  ;;  %s37_s25 = int_to_ptr.vmem [resolvable:$true] %s36_s25 }
   0x4   :  { %p1539_p1 = scmp.lt.u32.totalorder %s1535_s28, %s1917_s4 }
   0x6   :  { %p1541_p2 = pnand %p1539_p1, %p1536_p0 }
   0x8   :  { %1544 = shalt.err (!%p1541_p2)
}
   0x9   :  { %s1545_s10 = scalar_lea.vmem %s37_s25, 512  ;;  %p1550_p4 = scmp.lt.s32.totalorder %s37_s25, %s37_s25 }
   0xa   :  { %p1546_p3 = scmp.ne.s32.totalorder %s37_s25, %s1545_s10  ;;  %p1551_p5 = scmp.lt.s32.totalorder %s1545_s10, %s1545_s10 }
   0xc   :  { %p1552_p6 = por %p1551_p5, %p1550_p4 }
   0xe   :  { %p1553_p7 = pnand %p1552_p6, %p1546_p3 }
  0x10   :  { %1556 = shalt.err (!%p1553_p7)
}
  0x11   :  { %s1630_s11 = smov 128   ;;  %s1631_s12 = smov 8  }
  0x12   :  { %42 = dma.hbm_to_vmem [thread:$0]  %s1917_s4, 512, %s37_s25, [#allocation7], %s1630_s11, %s1630_s11, %s1631_s12  }
  0x13   :  { %s1632_s15 = smov [#allocation3]   ;;  %s1633_s17 = smov [#allocation8]  }
  0x14   :  { %s21_s16 = sshll.u32 %s1632_s15, 4  ;;  %s51_s18 = sshll.u32 %s1633_s17, 4  ;;  %s22_s16 = int_to_ptr.vmem [resolvable:$true] %s21_s16  ;;  %s52_s18 = int_to_ptr.vmem [resolvable:$true] %s51_s18 }
  0x15   :  { %s1557_s21 = scalar_lea.hbm %s1913_s0, 32 }
  0x16   :  { %p1558_p8 = scmp.ne.s32.totalorder %s1913_s0, %s1557_s21  ;;  %p1561_p9 = scmp.lt.u32.totalorder %s1557_s21, %s1913_s0 }
  0x18   :  { %p1563_p10 = pnand %p1561_p9, %p1558_p8 }
  0x1a   :  { %1566 = shalt.err (!%p1563_p10)
}
  0x1b   :  { %s1567_s4 = scalar_lea.vmem %s22_s16, 32  ;;  %p1572_p12 = scmp.lt.s32.totalorder %s22_s16, %s22_s16 }
  0x1c   :  { %p1568_p11 = scmp.ne.s32.totalorder %s22_s16, %s1567_s4  ;;  %p1573_p13 = scmp.lt.s32.totalorder %s1567_s4, %s1567_s4 }
  0x1e   :  { %p1574_p0 = por %p1573_p13, %p1572_p12 }
  0x20   :  { %p1575_p1 = pnand %p1574_p0, %p1568_p11 }
  0x22   :  { %1578 = shalt.err (!%p1575_p1)
}
  0x23   :  { %24 = dma.hbm_to_vmem [thread:$0]  %s1913_s0, 32, %s22_s16, [#allocation4]  }
  0x24   :  { %s1579_s30 = scalar_lea.hbm %s1919_s6, 128 }
  0x25   :  { %p1580_p2 = scmp.ne.s32.totalorder %s1919_s6, %s1579_s30  ;;  %p1583_p3 = scmp.lt.u32.totalorder %s1579_s30, %s1919_s6 }
  0x27   :  { %p1585_p4 = pnand %p1583_p3, %p1580_p2 }
  0x29   :  { %1588 = shalt.err (!%p1585_p4)
}
  0x2a   :  { %s1589_s14 = scalar_lea.vmem %s52_s18, 128  ;;  %p1594_p6 = scmp.lt.s32.totalorder %s52_s18, %s52_s18 }
  0x2b   :  { %p1590_p5 = scmp.ne.s32.totalorder %s52_s18, %s1589_s14  ;;  %p1595_p7 = scmp.lt.s32.totalorder %s1589_s14, %s1589_s14 }
  0x2d   :  { %p1596_p8 = por %p1595_p7, %p1594_p6 }
  0x2f   :  { %p1597_p9 = pnand %p1596_p8, %p1590_p5 }
  0x31   :  { %1600 = shalt.err (!%p1597_p9)
}
  0x32   :  { %54 = dma.hbm_to_vmem [thread:$0]  %s1919_s6, 128, %s52_s18, [#allocation7]  }
  0x33   :  { %1623 = dma.done.wait [#allocation4], 32  }
  0x34   :  { %1624 = vsyncadd [#allocation4], 4294967264 }
  0x35   :  { %1625 = dma.done.wait [#allocation7], 640  }
  0x36   :  { %1626 = vsyncadd [#allocation7], 4294966656  ;;  %v1634_v0 = vmov 0.0|0.0   ;;  %vm1635_vm0 = vmmov 0   ;;  %v1636_v1 = vmov 0.0   ;;  %v64_v2 = vld [vmem:[%s1914_s1] sm:$0xff] }
  0x37   :  { %1399 = vmatprep.subr.bf16.mxu1 %v1634_v0  ;;  %1278 = vmatprep.mubr.msk.f32.mxu1 %vm1635_vm0, %v1636_v1  ;;  %v65_v3 = vld [vmem:[%s1914_s1 + $0x8] sm:$0xff]  ;;  %v70_v5 = vld [vmem:[%s1916_s3] sm:$0xff]  ;;  %v72_v7 = vld [vmem:[%s1916_s3 + $0x10] sm:$0xff]  ;;  %vm96_vm1 = vcmask 130048   ;;  %vm175_vm2 = vcmask 261120   ;;  %s1638_s9 = smov 96  }
  0x38   :  { %1408 = vmatprep.subr.bf16.mxu0 %v1634_v0  ;;  %1300 = vmatprep.mubr.msk.f32.mxu0 %vm1635_vm0, %v1636_v1  ;;  %v1400_v4 = vpack.c.bf16 %v65_v3, %v64_v2  ;;  %v71_v6 = vld [vmem:[%s1916_s3 + $0x8] sm:$0xff]  ;;  %v73_v9 = vld [vmem:[%s1916_s3 + $0x18] sm:$0xff]  ;;  %v66_v10 = vld [vmem:[%s1915_s2] sm:$0xff]  ;;  %vm356_vm3 = vcmask 254976   ;;  %vm1069_vm4 = vcmask 523264   ;;  %vm1169_vm6 = vcmask 128000  }
  0x39   :  { %v1740_v8 = vpack.c.bf16 %v71_v6, %v70_v5  ;;  %v67_v11 = vld [vmem:[%s1915_s2 + $0x8] sm:$0xff]  ;;  %v91_v12 = vld [vmem:[#allocation3] sm:$0x3]  ;;  %v1752_v14 = vpack.c.bf16 %v73_v9, %v72_v7  ;;  %v69_v16 = vld [vmem:[%s1915_s2 + $0x18] sm:$0xff] }
  0x3a   :  { %1401 = vmatpush3.bf16.msra.mxu1 %v1400_v4  ;;  %v1403_v13 = vpack.c.bf16 %v67_v11, %v66_v10  ;;  %v68_v15 = vld [vmem:[%s1915_s2 + $0x10] sm:$0xff]  ;;  %s1637_s2 = smov 64  }
  0x3b   :  { %1410 = vmatpush3.bf16.msra.mxu0 %v1740_v8  ;;  %1402 = vmatprep.subr.bf16.mxu1 %v1634_v0  ;;  %v1406_v17 = vpack.c.bf16 %v69_v16, %v68_v15  ;;  %v1189_v18 = vld [vmem:[#allocation8] ss:$0 sm:$0xff]  ;;  %v1776_v23 = vld [vmem:[#allocation8 + $0x2] ss:$0 sm:$0xff]  ;;  %v1191_v27 = vld [vmem:[#allocation8 + $0x1] ss:$0 sm:$0xff] }
  0x3c   :  { %1411 = vmatprep.subr.bf16.mxu0 %v1634_v0 }
  0x3d   :  { %1279 = vmatmul.mubr.msk.f32.vlgmr.msra.gmra.mrb[0].mxu1 %vm96_vm1, %v91_v12 }
  0x3e   :  { %1404 = vmatpush3.bf16.msra.mxu1 %v1403_v13  ;;  %1289 = vmatprep.mubr.msk.f32.mxu1 %vm1635_vm0, %v1636_v1 }
  0x3f   :  { %1413 = vmatpush3.bf16.msra.mxu0 %v1752_v14  ;;  %1405 = vmatprep.subr.bf16.mxu1 %v1634_v0 }
  0x40   :  { %1420 = vmatprep.subr.bf16.mxu0 %v1634_v0 }
  0x42   :  { %1301 = vmatmul.mubr.f32.vlgmr.msra.gmra.mrb[0].mxu0 %v1636_v1  ;;  %1407 = vmatpush3.bf16.msra.mxu1 %v1406_v17 }
  0x43   :  { %1422 = vmatpush3.bf16.msra.mxu0 %v1740_v8  ;;  %1322 = vmatprep.mubr.msk.f32.mxu0 %vm1635_vm0, %v1636_v1 }
  0x44   :  { %1423 = vmatprep.subr.bf16.mxu0 %v1634_v0  ;;  %1414 = vmatprep.subr.bf16.mxu1 %v1634_v0 }
  0x47   :  { %1425 = vmatpush3.bf16.msra.mxu0 %v1752_v14 }
  0x48   :  { %1432 = vmatprep.subr.bf16.mxu0 %v1634_v0 }
 0x110   :  { %v166_v19 = vpop.f32.mrb[0].mxu1 }
 0x111   :  { %v167_v20 = vadd.f32 %v1189_v18, %v166_v19  ;;  %v1280_v21 = vpop.f32.mrb[1].mxu1 }
 0x113   :  { %v170_v22 = vmax.f32 %v167_v20, 0.0 }
 0x115   :  { %1290 = vmatmul.mubr.msk.f32.vlgmr.msra.gmra.mrb[2].mxu1 %vm175_vm2, %v170_v22  ;;  %v322_v24 = vpop.f32.mrb[0].mxu0 }
 0x116   :  { %v323_v25 = vadd.f32 %v1776_v23, %v322_v24  ;;  %v1302_v26 = vpop.f32.mrb[1].mxu0  ;;  %1416 = vmatpush3.bf16.msra.mxu1 %v1740_v8  ;;  %1311 = vmatprep.mubr.msk.f32.mxu1 %vm1635_vm0, %v1636_v1 }
 0x117   :  { %1417 = vmatprep.subr.bf16.mxu1 %v1634_v0 }
 0x118   :  { %334 = vrot.lane.b32.xlu0 %v323_v25, %s1637_s2 }
 0x11a   :  { %1419 = vmatpush3.bf16.msra.mxu1 %v1752_v14 }
 0x11b   :  { %1426 = vmatprep.subr.bf16.mxu1 %v1634_v0 }
 0x18a   :  { %v335_v35 = vpop.permute.xlu0 %334 }
 0x1e8   :  { %v245_v28 = vpop.f32.mrb[2].mxu1 }
 0x1e9   :  { %v1787_v29 = vadd.f32 %v1191_v27, %v245_v28  ;;  %v1291_v30 = vpop.f32.mrb[3].mxu1 }
 0x1eb   :  { %v326_v31 = vadd.f32 %v323_v25, %v1787_v29 }
 0x1ed   :  { %v1194_v32 = vmul.f32 -1.442695, %v326_v31 }
 0x1ef   :  { %1485 = vpow2.f32 %v1194_v32 }
 0x1f9   :  { %v1486_v33 = vpop.eup %1485 }
 0x1fa   :  { %v330_v34 = vadd.f32 1.0, %v1486_v33 }
 0x1fc   :  { %1487 = vrcp.f32 %v330_v34 }
 0x206   :  { %v1488_v36 = vpop.eup %1487 }
 0x207   :  { %v337_v37 = vmul.f32 %v1488_v36, %v335_v35  ;;  %v344_v41 = vsub.f32 1.0, %v1488_v36  ;;  %v350_v43 = vmul.f32 0.0, %v1488_v36 }
 0x209   :  { %339 = vrot.lane.b32.xlu0 %v337_v37, %s1637_s2 }
 0x27b   :  { %v340_v38 = vpop.permute.xlu0 %339 }
 0x27c   :  { %v342_v39 = vadd.f32 %v340_v38, %v1787_v29 }
 0x27e   :  { %1489 = vtanh.f32 %v342_v39 }
 0x288   :  { %v1490_v40 = vpop.eup %1489 }
 0x289   :  { %346 = vrot.lane.b32.xlu1 %v1490_v40, %s1638_s9 }
 0x2fb   :  { %v347_v42 = vpop.permute.xlu1 %346 }
 0x2fc   :  { %v349_v44 = vmul.f32 %v347_v42, %v344_v41 }
 0x2fe   :  { %v351_v45 = vadd.f32 %v350_v43, %v349_v44 }
 0x300   :  { %353 = vrot.lane.b32.xlu1 %v351_v45, %s1638_s9 }
 0x372   :  { %v354_v46 = vpop.permute.xlu1 %353 }
 0x373   :  { %357 = vst.msk [vmem:[#allocation2] sm:$0x3] %vm356_vm3, %v354_v46  ;;  %1312 = vmatmul.mubr.msk.f32.vlgmr.msra.gmra.mrb[4].mxu1 %vm175_vm2, %v354_v46 }
 0x374   :  { %1428 = vmatpush3.bf16.msra.mxu1 %v1740_v8  ;;  %1333 = vmatprep.mubr.msk.f32.mxu1 %vm1635_vm0, %v1636_v1 }
 0x375   :  { %1429 = vmatprep.subr.bf16.mxu1 %v1634_v0 }
 0x378   :  { %1431 = vmatpush3.bf16.msra.mxu1 %v1752_v14 }
 0x379   :  { %1438 = vmatprep.subr.bf16.mxu1 %v1634_v0 }
 0x446   :  { %v426_v47 = vpop.f32.mrb[4].mxu1 }
 0x447   :  { %v427_v48 = vadd.f32 %v1776_v23, %v426_v47  ;;  %v1313_v49 = vpop.f32.mrb[5].mxu1 }
 0x449   :  { %438 = vrot.lane.b32.xlu0 %v427_v48, %s1637_s2  ;;  %v430_v50 = vadd.f32 %v427_v48, %v1787_v29 }
 0x44b   :  { %v1196_v51 = vmul.f32 -1.442695, %v430_v50 }
 0x44d   :  { %1491 = vpow2.f32 %v1196_v51 }
 0x457   :  { %v1492_v52 = vpop.eup %1491 }
 0x458   :  { %v434_v53 = vadd.f32 1.0, %v1492_v52 }
 0x45a   :  { %1493 = vrcp.f32 %v434_v53 }
 0x464   :  { %v1494_v54 = vpop.eup %1493 }
 0x465   :  { %v448_v60 = vsub.f32 1.0, %v1494_v54  ;;  %v454_v62 = vmul.f32 %v1494_v54, %v351_v45 }
 0x4bb   :  { %v439_v55 = vpop.permute.xlu0 %438 }
 0x4bc   :  { %v441_v56 = vmul.f32 %v1494_v54, %v439_v55 }
 0x4be   :  { %443 = vrot.lane.b32.xlu1 %v441_v56, %s1637_s2 }
 0x530   :  { %v444_v57 = vpop.permute.xlu1 %443 }
 0x531   :  { %v446_v58 = vadd.f32 %v444_v57, %v1787_v29 }
 0x533   :  { %1495 = vtanh.f32 %v446_v58 }
 0x53d   :  { %v1496_v59 = vpop.eup %1495 }
 0x53e   :  { %450 = vrot.lane.b32.xlu0 %v1496_v59, %s1638_s9 }
 0x5b0   :  { %v451_v61 = vpop.permute.xlu0 %450 }
 0x5b1   :  { %v453_v63 = vmul.f32 %v451_v61, %v448_v60 }
 0x5b3   :  { %v455_v2 = vadd.f32 %v454_v62, %v453_v63 }
 0x5b5   :  { %457 = vrot.lane.b32.xlu1 %v455_v2, %s1638_s9 }
 0x627   :  { %v458_v3 = vpop.permute.xlu1 %457 }
 0x628   :  { %460 = vst.msk [vmem:[#allocation2 + $0x2] sm:$0x3] %vm356_vm3, %v458_v3  ;;  %1323 = vmatmul.mubr.msk.f32.vlgmr.msra.gmra.mrb[2].mxu0 %vm175_vm2, %v458_v3 }
 0x629   :  { %1434 = vmatpush3.bf16.msra.mxu0 %v1740_v8  ;;  %1344 = vmatprep.mubr.msk.f32.mxu0 %vm1635_vm0, %v1636_v1 }
 0x62a   :  { %1435 = vmatprep.subr.bf16.mxu0 %v1634_v0 }
 0x62d   :  { %1437 = vmatpush3.bf16.msra.mxu0 %v1752_v14 }
 0x62e   :  { %1444 = vmatprep.subr.bf16.mxu0 %v1634_v0 }
 0x6fb   :  { %v529_v4 = vpop.f32.mrb[2].mxu0 }
 0x6fc   :  { %v530_v5 = vadd.f32 %v1776_v23, %v529_v4  ;;  %v1324_v6 = vpop.f32.mrb[3].mxu0 }
 0x6fe   :  { %541 = vrot.lane.b32.xlu0 %v530_v5, %s1637_s2  ;;  %v533_v7 = vadd.f32 %v530_v5, %v1787_v29 }
 0x700   :  { %v1198_v9 = vmul.f32 -1.442695, %v533_v7 }
 0x702   :  { %1497 = vpow2.f32 %v1198_v9 }
 0x70c   :  { %v1498_v10 = vpop.eup %1497 }
 0x70d   :  { %v537_v11 = vadd.f32 1.0, %v1498_v10 }
 0x70f   :  { %1499 = vrcp.f32 %v537_v11 }
 0x719   :  { %v1500_v12 = vpop.eup %1499 }
 0x71a   :  { %v551_v19 = vsub.f32 1.0, %v1500_v12  ;;  %v557_v21 = vmul.f32 %v1500_v12, %v455_v2 }
 0x770   :  { %v542_v13 = vpop.permute.xlu0 %541 }
 0x771   :  { %v544_v15 = vmul.f32 %v1500_v12, %v542_v13 }
 0x773   :  { %546 = vrot.lane.b32.xlu1 %v544_v15, %s1637_s2 }
 0x7e5   :  { %v547_v16 = vpop.permute.xlu1 %546 }
 0x7e6   :  { %v549_v17 = vadd.f32 %v547_v16, %v1787_v29 }
 0x7e8   :  { %1501 = vtanh.f32 %v549_v17 }
 0x7f2   :  { %v1502_v18 = vpop.eup %1501 }
 0x7f3   :  { %553 = vrot.lane.b32.xlu0 %v1502_v18, %s1638_s9 }
 0x865   :  { %v554_v20 = vpop.permute.xlu0 %553 }
 0x866   :  { %v556_v22 = vmul.f32 %v554_v20, %v551_v19 }
 0x868   :  { %v558_v24 = vadd.f32 %v557_v21, %v556_v22 }
 0x86a   :  { %560 = vrot.lane.b32.xlu1 %v558_v24, %s1638_s9 }
 0x8dc   :  { %v561_v25 = vpop.permute.xlu1 %560 }
 0x8dd   :  { %563 = vst.msk [vmem:[#allocation2 + $0x4] sm:$0x3] %vm356_vm3, %v561_v25  ;;  %1334 = vmatmul.mubr.msk.f32.vlgmr.msra.gmra.mrb[6].mxu1 %vm175_vm2, %v561_v25 }
 0x8de   :  { %1440 = vmatpush3.bf16.msra.mxu1 %v1740_v8  ;;  %1355 = vmatprep.mubr.msk.f32.mxu1 %vm1635_vm0, %v1636_v1 }
 0x8df   :  { %1441 = vmatprep.subr.bf16.mxu1 %v1634_v0 }
 0x8e2   :  { %1443 = vmatpush3.bf16.msra.mxu1 %v1752_v14 }
 0x9b0   :  { %v632_v26 = vpop.f32.mrb[6].mxu1 }
 0x9b1   :  { %v633_v27 = vadd.f32 %v1776_v23, %v632_v26  ;;  %v1335_v28 = vpop.f32.mrb[7].mxu1 }
 0x9b3   :  { %644 = vrot.lane.b32.xlu0 %v633_v27, %s1637_s2  ;;  %v636_v30 = vadd.f32 %v633_v27, %v1787_v29 }
 0x9b5   :  { %v1200_v31 = vmul.f32 -1.442695, %v636_v30 }
 0x9b7   :  { %1503 = vpow2.f32 %v1200_v31 }
 0x9c1   :  { %v1504_v32 = vpop.eup %1503 }
 0x9c2   :  { %v640_v33 = vadd.f32 1.0, %v1504_v32 }
 0x9c4   :  { %1505 = vrcp.f32 %v640_v33 }
 0x9ce   :  { %v1506_v34 = vpop.eup %1505 }
 0x9cf   :  { %v654_v40 = vsub.f32 1.0, %v1506_v34  ;;  %v660_v42 = vmul.f32 %v1506_v34, %v558_v24 }
 0xa25   :  { %v645_v35 = vpop.permute.xlu0 %644 }
 0xa26   :  { %v647_v36 = vmul.f32 %v1506_v34, %v645_v35  ;;  %v74_v35 = vld [vmem:[#allocation6] sm:$0xff] }
 0xa28   :  { %649 = vrot.lane.b32.xlu1 %v647_v36, %s1637_s2  ;;  %v75_v36 = vld [vmem:[#allocation6 + $0x8] sm:$0xff] }
 0xa9a   :  { %v650_v37 = vpop.permute.xlu1 %649 }
 0xa9b   :  { %v652_v38 = vadd.f32 %v650_v37, %v1787_v29  ;;  %v1450_v37 = vpack.c.bf16 %v75_v36, %v74_v35 }
 0xa9d   :  { %1507 = vtanh.f32 %v652_v38  ;;  %1451 = vmatprep.subr.bf16.mxu1 %v1450_v37  ;;  %v76_v38 = vld [vmem:[#allocation6 + $0x10] sm:$0xff] }
 0xaa7   :  { %v1508_v39 = vpop.eup %1507 }
 0xaa8   :  { %656 = vrot.lane.b32.xlu0 %v1508_v39, %s1638_s9  ;;  %v77_v39 = vld [vmem:[#allocation6 + $0x18] sm:$0xff] }
 0xb1a   :  { %v657_v41 = vpop.permute.xlu0 %656 }
 0xb1b   :  { %v659_v43 = vmul.f32 %v657_v41, %v654_v40  ;;  %v1454_v40 = vpack.c.bf16 %v77_v39, %v76_v38 }
 0xb1d   :  { %v661_v44 = vadd.f32 %v660_v42, %v659_v43  ;;  %v79_v43 = vld [vmem:[%s1918_s5 + $0x8] sm:$0xff] }
 0xb1f   :  { %663 = vrot.lane.b32.xlu1 %v661_v44, %s1638_s9 }
 0xb91   :  { %v664_v45 = vpop.permute.xlu1 %663 }
 0xb92   :  { %666 = vst.msk [vmem:[#allocation2 + $0x6] sm:$0x3] %vm356_vm3, %v664_v45  ;;  %1345 = vmatmul.mubr.msk.f32.vlgmr.msra.gmra.mrb[4].mxu0 %vm175_vm2, %v664_v45 }
 0xb93   :  { %1446 = vmatpush3.bf16.msra.mxu0 %v1740_v8  ;;  %1366 = vmatprep.mubr.msk.f32.mxu0 %vm1635_vm0, %v1636_v1 }
 0xb94   :  { %1447 = vmatprep.subr.bf16.mxu0 %v1634_v0 }
 0xb97   :  { %1449 = vmatpush3.bf16.msra.mxu0 %v1752_v14 }
 0xb99   :  { %v976_v61 = vld [vmem:[#allocation2] sm:$0xff] }
 0xc65   :  { %v735_v46 = vpop.f32.mrb[4].mxu0 }
 0xc66   :  { %v736_v47 = vadd.f32 %v1776_v23, %v735_v46  ;;  %v1346_v48 = vpop.f32.mrb[5].mxu0 }
 0xc67   :  { %v81_v48 = vld [vmem:[%s1918_s5 + $0x18] sm:$0xff] }
 0xc68   :  { %747 = vrot.lane.b32.xlu0 %v736_v47, %s1637_s2  ;;  %v739_v49 = vadd.f32 %v736_v47, %v1787_v29 }
 0xc6a   :  { %v1202_v50 = vmul.f32 -1.442695, %v739_v49 }
 0xc6c   :  { %1509 = vpow2.f32 %v1202_v50  ;;  %v82_v50 = vld [vmem:[%s1918_s5 + $0x20] sm:$0xff] }
 0xc76   :  { %v1510_v51 = vpop.eup %1509 }
 0xc77   :  { %v743_v52 = vadd.f32 1.0, %v1510_v51  ;;  %v83_v51 = vld [vmem:[%s1918_s5 + $0x28] sm:$0xff] }
 0xc79   :  { %1511 = vrcp.f32 %v743_v52 }
 0xc83   :  { %v1512_v8 = vpop.eup %1511 }
 0xc84   :  { %v757_v55 = vsub.f32 1.0, %v1512_v8  ;;  %v763_v57 = vmul.f32 %v1512_v8, %v661_v44  ;;  %v80_v44 = vld [vmem:[%s1918_s5 + $0x10] sm:$0xff] }
 0xc85   :  { %v1462_v49 = vpack.c.bf16 %v81_v48, %v80_v44 }
 0xcda   :  { %v748_v53 = vpop.permute.xlu0 %747 }
 0xcdb   :  { %v750_v1 = vmul.f32 %v1512_v8, %v748_v53  ;;  %v1466_v8 = vpack.c.bf16 %v83_v51, %v82_v50 }
 0xcdd   :  { %752 = vrot.lane.b32.xlu1 %v750_v1, %s1637_s2 }
 0xd4f   :  { %v753_v0 = vpop.permute.xlu1 %752 }
 0xd50   :  { %v755_v14 = vadd.f32 %v753_v0, %v1787_v29  ;;  %v84_v0 = vld [vmem:[%s1918_s5 + $0x30] sm:$0xff] }
 0xd52   :  { %1513 = vtanh.f32 %v755_v14  ;;  %v85_v14 = vld [vmem:[%s1918_s5 + $0x38] sm:$0xff] }
 0xd5c   :  { %v1514_v54 = vpop.eup %1513 }
 0xd5d   :  { %759 = vrot.lane.b32.xlu0 %v1514_v54, %s1638_s9  ;;  %v1470_v54 = vpack.c.bf16 %v85_v14, %v84_v0 }
 0xdcf   :  { %v760_v56 = vpop.permute.xlu0 %759 }
 0xdd0   :  { %v762_v58 = vmul.f32 %v760_v56, %v757_v55  ;;  %v1207_v55 = vld [vmem:[#allocation8 + $0x3] ss:$0 sm:$0xff] }
 0xdd2   :  { %v764_v59 = vadd.f32 %v763_v57, %v762_v58 }
 0xdd4   :  { %766 = vrot.lane.b32.xlu1 %v764_v59, %s1638_s9 }
 0xe46   :  { %v767_v60 = vpop.permute.xlu1 %766 }
 0xe47   :  { %769 = vst.msk [vmem:[#allocation2 + $0x8] sm:$0x3] %vm356_vm3, %v767_v60  ;;  %1356 = vmatmul.mubr.msk.f32.vlgmr.msra.gmra.mrb[8].mxu1 %vm175_vm2, %v767_v60 }
 0xe48   :  { %1377 = vmatprep.mubr.msk.f32.mxu1 %vm175_vm2, %v976_v61  ;;  %1453 = vmatpush3.bf16.msra.mxu1 %v1450_v37 }
 0xe49   :  { %1455 = vmatprep.subr.bf16.mxu1 %v1454_v40 }
 0xe4c   :  { %1457 = vmatpush3.bf16.msra.mxu1 %v1454_v40 }
 0xf1a   :  { %v838_v62 = vpop.f32.mrb[8].mxu1 }
 0xf1b   :  { %v839_v63 = vadd.f32 %v1776_v23, %v838_v62  ;;  %v1357_v2 = vpop.f32.mrb[9].mxu1  ;;  %v1210_v62 = vld [vmem:[#allocation8 + $0x4] ss:$0 sm:$0xff] }
 0xf1d   :  { %850 = vrot.lane.b32.xlu0 %v839_v63, %s1637_s2  ;;  %v842_v3 = vadd.f32 %v839_v63, %v1787_v29 }
 0xf1f   :  { %v1204_v4 = vmul.f32 -1.442695, %v842_v3 }
 0xf21   :  { %1515 = vpow2.f32 %v1204_v4 }
 0xf2b   :  { %v1516_v5 = vpop.eup %1515 }
 0xf2c   :  { %v846_v6 = vadd.f32 1.0, %v1516_v5 }
 0xf2e   :  { %1517 = vrcp.f32 %v846_v6 }
 0xf38   :  { %v1518_v7 = vpop.eup %1517 }
 0xf39   :  { %v860_v15 = vsub.f32 1.0, %v1518_v7  ;;  %v866_v17 = vmul.f32 %v1518_v7, %v764_v59 }
 0xf8f   :  { %v851_v9 = vpop.permute.xlu0 %850 }
 0xf90   :  { %v853_v10 = vmul.f32 %v1518_v7, %v851_v9 }
 0xf92   :  { %855 = vrot.lane.b32.xlu1 %v853_v10, %s1637_s2 }
0x1004   :  { %v856_v11 = vpop.permute.xlu1 %855 }
0x1005   :  { %v858_v12 = vadd.f32 %v856_v11, %v1787_v29 }
0x1007   :  { %1519 = vtanh.f32 %v858_v12  ;;  %v1151_v12 = vlaneseq }
0x1011   :  { %v1520_v13 = vpop.eup %1519 }
0x1012   :  { %862 = vrot.lane.b32.xlu0 %v1520_v13, %s1638_s9  ;;  %v1152_v13 = vand.u32 127, %v1151_v12 }
0x1014   :  { %vm1153_vm5 = vcmp.lt.s32.totalorder %v1152_v13, 8 }
0x1084   :  { %v863_v16 = vpop.permute.xlu0 %862 }
0x1085   :  { %v865_v18 = vmul.f32 %v863_v16, %v860_v15 }
0x1087   :  { %v867_v19 = vadd.f32 %v866_v17, %v865_v18 }
0x1089   :  { %869 = vrot.lane.b32.xlu1 %v867_v19, %s1638_s9 }
0x10fb   :  { %v870_v20 = vpop.permute.xlu1 %869 }
0x10fc   :  { %872 = vst.msk [vmem:[#allocation2 + $0xa] sm:$0x3] %vm356_vm3, %v870_v20  ;;  %1367 = vmatmul.mubr.msk.f32.vlgmr.msra.gmra.mrb[6].mxu0 %vm175_vm2, %v870_v20 }
0x11cf   :  { %v941_v21 = vpop.f32.mrb[6].mxu0 }
0x11d0   :  { %v942_v22 = vadd.f32 %v1776_v23, %v941_v21  ;;  %v1368_v24 = vpop.f32.mrb[7].mxu0 }
0x11d2   :  { %953 = vrot.lane.b32.xlu0 %v942_v22, %s1637_s2  ;;  %v945_v25 = vadd.f32 %v942_v22, %v1787_v29 }
0x11d4   :  { %v1206_v26 = vmul.f32 -1.442695, %v945_v25 }
0x11d6   :  { %1521 = vpow2.f32 %v1206_v26 }
0x11e0   :  { %v1522_v27 = vpop.eup %1521 }
0x11e1   :  { %v949_v28 = vadd.f32 1.0, %v1522_v27 }
0x11e3   :  { %1523 = vrcp.f32 %v949_v28 }
0x11ed   :  { %v1524_v30 = vpop.eup %1523 }
0x11ee   :  { %v963_v41 = vsub.f32 1.0, %v1524_v30  ;;  %v969_v45 = vmul.f32 %v1524_v30, %v867_v19 }
0x1244   :  { %v954_v31 = vpop.permute.xlu0 %953 }
0x1245   :  { %v956_v32 = vmul.f32 %v1524_v30, %v954_v31 }
0x1247   :  { %958 = vrot.lane.b32.xlu1 %v956_v32, %s1637_s2 }
0x12b9   :  { %v959_v33 = vpop.permute.xlu1 %958 }
0x12ba   :  { %v961_v34 = vadd.f32 %v959_v33, %v1787_v29  ;;  %v78_v29 = vld [vmem:[%s1918_s5] sm:$0xff]  ;;  %s1639_s5 = smov [#allocation9]  }
0x12bb   :  { %v1458_v47 = vpack.c.bf16 %v79_v43, %v78_v29  ;;  %s1176_s4 = sshll.u32 %s1639_s5, 4  ;;  %s1177_s4 = int_to_ptr.vmem [resolvable:$true] %s1176_s4 }
0x12bc   :  { %1525 = vtanh.f32 %v961_v34  ;;  %s1601_s1 = scalar_lea.vmem %s1177_s4, 256  ;;  %p1606_p11 = scmp.lt.s32.totalorder %s1177_s4, %s1177_s4 }
0x12bd   :  { %1459 = vmatprep.subr.bf16.mxu0 %v1458_v47  ;;  %p1602_p10 = scmp.ne.s32.totalorder %s1177_s4, %s1601_s1  ;;  %p1607_p12 = scmp.lt.s32.totalorder %s1601_s1, %s1601_s1 }
0x12be   :  { %1461 = vmatpush3.bf16.msra.mxu0 %v1458_v47 }
0x12bf   :  { %1463 = vmatprep.subr.bf16.mxu0 %v1462_v49  ;;  %p1608_p13 = por %p1607_p12, %p1606_p11 }
0x12c1   :  { %p1609_p0 = pnand %p1608_p13, %p1602_p10 }
0x12c2   :  { %1465 = vmatpush3.bf16.msra.mxu0 %v1462_v49 }
0x12c3   :  { %1467 = vmatprep.subr.bf16.mxu0 %v1466_v8 }
0x12c6   :  { %v1526_v23 = vpop.eup %1525  ;;  %1469 = vmatpush3.bf16.msra.mxu0 %v1466_v8 }
0x12c7   :  { %965 = vrot.lane.b32.xlu0 %v1526_v23, %s1638_s9  ;;  %1471 = vmatprep.subr.bf16.mxu0 %v1470_v54 }
0x12ca   :  { %1473 = vmatpush3.bf16.msra.mxu0 %v1470_v54 }
0x1339   :  { %v966_v42 = vpop.permute.xlu0 %965 }
0x133a   :  { %v968_v46 = vmul.f32 %v966_v42, %v963_v41 }
0x133c   :  { %v970_v52 = vadd.f32 %v969_v45, %v968_v46 }
0x133e   :  { %972 = vrot.lane.b32.xlu1 %v970_v52, %s1638_s9 }
0x13b0   :  { %v973_v53 = vpop.permute.xlu1 %972 }
0x13b1   :  { %975 = vst.msk [vmem:[#allocation2 + $0xc] sm:$0x3] %vm356_vm3, %v973_v53 }
0x13b8   :  { %v977_v1 = vld [vmem:[#allocation2 + $0x8] sm:$0x3f] }
0x13b9   :  { %1378 = vmatmul.mubr.msk.f32.vlgmr.msra.gmra.mrb[10].mxu1 %vm175_vm2, %v977_v1 }
0x148c   :  { %v1379_v56 = vpop.f32.mrb[10].mxu1 }
0x148d   :  { %v1060_v57 = vadd.f32 %v1379_v56, %v1207_v55  ;;  %v1054_v58 = vpop.f32.mrb[11].mxu1 }
0x148e   :  { %v1055_v59 = vadd.f32 %v1207_v55, %v1054_v58 }
0x148f   :  { %v1064_v61 = vmax.f32 %v1060_v57, 0.0 }
0x1490   :  { %v1063_v60 = vmax.f32 %v1055_v59, 0.0 }
0x1492   :  { %1396 = vmatprep.mubr.msk.f32.mxu0 %vm1069_vm4, %v1063_v60 }
0x1493   :  { %1397 = vmatmul.mubr.msk.f32.vlgmr.msra.gmra.mrb[8].mxu0 %vm1069_vm4, %v1064_v61 }
0x1566   :  { %v1398_v63 = vpop.f32.mrb[8].mxu0 }
0x1567   :  { %v1148_v2 = vadd.f32 %v1398_v63, %v1210_v62  ;;  %v1142_v3 = vpop.f32.mrb[9].mxu0 }
0x1568   :  { %v1143_v4 = vadd.f32 %v1210_v62, %v1142_v3 }
0x1569   :  { %v1214_v5 = vmul.f32 -1.442695, %v1148_v2 }
0x156a   :  { %v1213_v6 = vmul.f32 -1.442695, %v1143_v4 }
0x156b   :  { %1527 = vpow2.f32 %v1214_v5 }
0x156c   :  { %1529 = vpow2.f32 %v1213_v6 }
0x1575   :  { %v1528_v7 = vpop.eup %1527 }
0x1576   :  { %v1530_v9 = vpop.eup %1529  ;;  %v1161_v10 = vadd.f32 1.0, %v1528_v7 }
0x1577   :  { %v1160_v11 = vadd.f32 1.0, %v1530_v9 }
0x1578   :  { %1531 = vrcp.f32 %v1161_v10 }
0x1579   :  { %1533 = vrcp.f32 %v1160_v11 }
0x1582   :  { %v1532_v15 = vpop.eup %1531 }
0x1583   :  { %v1534_v16 = vpop.eup %1533  ;;  %v1167_v17 = vsel %vm1153_vm5, %v1148_v2, %v1532_v15 }
0x1584   :  { %v1166_v18 = vsel %vm1153_vm5, %v1143_v4, %v1534_v16  ;;  %1170 = vst.msk [vmem:[#allocation9 + $0x8] sm:$0x3f] %vm1169_vm6, %v1167_v17 }
0x1585   :  { %1168 = vst.msk [vmem:[#allocation9] sm:$0xff] %vm96_vm1, %v1166_v18 }
0x1586   :  { %1612 = shalt.err (!%p1609_p0)
}
0x1587   :  { %s1613_s28 = scalar_lea.hbm %s1920_s7, 256 }
0x1588   :  { %p1614_p1 = scmp.ne.s32.totalorder %s1920_s7, %s1613_s28  ;;  %p1617_p2 = scmp.lt.u32.totalorder %s1613_s28, %s1920_s7 }
0x158a   :  { %p1619_p3 = pnand %p1617_p2, %p1614_p1 }
0x158c   :  { %1622 = shalt.err (!%p1619_p3)
}
0x158d   :  { %1182 = dma.vmem_to_hbm [thread:$0]  %s1177_s4, 256, %s1920_s7, [#allocation5], %s1630_s11, %s1630_s11, %s1631_s12  }
0x158e   :  { %1627 = dma.done.wait [#allocation5], 256  }
0x158f   :  { %1628 = vsyncadd [#allocation5], 4294967040 }
0x1590   :  { %1186 = vsyncpa [#allocation4], 1 }
0x1591   :  { %1187 = vsyncpa [#allocation7], 1 }
0x1592   :  { %1188 = vsyncpa [#allocation5], 1 }

</bundles_post_ra>
